<compile_context>
chip_gen: v5e
topology: v5e:2x2
jax: 0.10.0
libtpu: 0.0.40
codegen_flags: <defaults>
</compile_context>

<pallas_src>
import jax
import jax.numpy as jnp
import numpy as np
from jax.experimental import pallas as pl

C_IN = 3
NUM_KERNELS = 6
KERNEL_SIZE = (8, 3)
SEQ_LEN = 8
WIDTH = 4
BATCH = 1  # PyTorch forward only type-checks for batch == 1 (3-D conv2d input)


def _conv_tap_kernel(k_ref, p_ref, o_ref):
    """out = kernels @ patches^T as unrolled f32 VPU multiply-accumulates.

    k_ref: (NUM_KERNELS, kh*kw)               flattened conv kernels
    p_ref: (kh*kw, c_in*H_out*W_out)          transposed im2col patches (lane-dense)
    o_ref: (NUM_KERNELS, c_in*H_out*W_out)    lane-dense conv outputs
    """
    k = k_ref[...]
    p = p_ref[...]
    khw = k_ref.shape[1]

    # Two-level accumulation: sequential MAC within groups of GROUP taps
    # (bounds the number of live partial vregs), then a short balanced tree
    # over the group partials to shorten the serial f32-add chain.
    GROUP = 4
    partials = []
    for g0 in range(0, khw, GROUP):            # static unroll: kh*kw = 24 taps
        acc = k[:, g0:g0 + 1] * p[g0:g0 + 1, :]
        for t in range(g0 + 1, min(g0 + GROUP, khw)):
            acc = acc + k[:, t:t + 1] * p[t:t + 1, :]
        partials.append(acc)
    while len(partials) > 1:
        nxt = [partials[i] + partials[i + 1]
               for i in range(0, len(partials) - 1, 2)]
        if len(partials) % 2:
            nxt.append(partials[-1])
        partials = nxt
    o_ref[...] = partials[0]


def _im2col_patches_t(x, kernel_size):
    """Clamp-gather + zero-pad + im2col, returned transposed (lane-dense).

    Returns (kh*kw, c_in*H_out*W_out) float32 plus (H_out, W_out).
    All indices are static; XLA fuses this tiny (~29 KB) gather.
    """
    B, S, c_in, W = x.shape
    kh, kw = kernel_size
    ph, pw = kh // 2, kw // 2
    # Rows of the (kw*S, W) sliding-window image; out-of-range indices clamp
    # to S-1, exactly like the PyTorch index-padding loop.
    rows = jnp.minimum(
        jnp.arange(S)[:, None] + jnp.arange(kw)[None, :], S - 1).reshape(-1)
    g = jnp.transpose(x[0], (1, 0, 2))[:, rows, :]            # (c_in, kw*S, W)
    gpad = jnp.pad(g, ((0, 0), (ph, ph), (pw, pw)))           # zero padding
    H_in = kw * S
    H_out = H_in + 2 * ph - kh + 1
    W_out = W + 2 * pw - kw + 1
    h_idx = jnp.arange(H_out)[:, None] + jnp.arange(kh)[None, :]   # (H_out, kh)
    w_idx = jnp.arange(W_out)[:, None] + jnp.arange(kw)[None, :]   # (W_out, kw)
    patches = gpad[:, h_idx[:, None, :, None], w_idx[None, :, None, :]]
    # patches: (c_in, H_out, W_out, kh, kw) -> (kh*kw, c_in*H_out*W_out)
    p_t = jnp.transpose(patches, (3, 4, 0, 1, 2)).reshape(
        kh * kw, c_in * H_out * W_out)
    return p_t, H_out, W_out


def token_embedding_forward(x, kernels, random_channel=0):
    """Pallas implementation of TokenEmbedding.forward.

    x: (1, S, c_in, W) float32; kernels: (num_kernels, kh, kw) float32.
    """
    # TODO(synk): PyTorch picks `random_channel` via torch.randint (non-
    # deterministic); here it is a fixed static argument (default 0).
    B, S, c_in, W = x.shape
    num_kernels, kh, kw = kernels.shape
    # TODO(synk): the im2col clamp-gather stays as tiny XLA glue; an in-kernel
    # fancy gather over these awkward sub-(8,128) shapes risks Mosaic lowering
    # failures for no measurable gain at ~29 KB.
    p_t, H_out, W_out = _im2col_patches_t(x, (kh, kw))
    hw = H_out * W_out
    k_flat = kernels.reshape(num_kernels, kh * kw)

    # Single invocation, whole arrays in VMEM (no grid, no per-step overhead).
    y = pl.pallas_call(
        _conv_tap_kernel,
        out_shape=jax.ShapeDtypeStruct((num_kernels, c_in * hw), jnp.float32),
    )(k_flat, p_t)

    Y = y.reshape(num_kernels, c_in, H_out, W_out)
    # PyTorch stack order: j = channel * (num_kernels-1) + kernel_idx,
    # followed by the single (random_channel, last-kernel) conv output.
    main = jnp.transpose(Y[:num_kernels - 1], (2, 3, 1, 0))
    main = main.reshape(H_out, W_out, c_in * (num_kernels - 1))
    last = Y[num_kernels - 1, random_channel][:, :, None]
    stacked = jnp.concatenate([main, last], axis=-1)    # (H_out, W_out, Nout)
    return stacked.reshape(B, S, -1)


def token_embedding_reference(x, kernels, random_channel=0):
    """Independent pure-JAX replica of the PyTorch forward (for checking)."""
    B, S, c_in, W = x.shape
    num_kernels, kh, kw = kernels.shape
    rows = jnp.minimum(
        jnp.arange(S)[:, None] + jnp.arange(kw)[None, :], S - 1).reshape(-1)

    def conv_one(channel, kidx):
        g = x[0, :, channel, :][rows, :]                       # (kw*S, W)
        o = jax.lax.conv_general_dilated(
            g[None, None], kernels[kidx][None, None],
            window_strides=(1, 1),
            padding=((kh // 2, kh // 2), (kw // 2, kw // 2)),
            precision=jax.lax.Precision.HIGHEST)
        return o[0]                                            # (1, H_out, W_out)

    outputs = []
    for ch in range(c_in):
        for kidx in range(num_kernels - 1):
            outputs.append(conv_one(ch, kidx))
    outputs.append(conv_one(random_channel, num_kernels - 1))
    stacked = jnp.stack(outputs, axis=-1)                      # (1,H_out,W_out,N)
    return stacked.reshape(B, S, -1)


if __name__ == "__main__":
    key = jax.random.PRNGKey(0)
    kx, kker = jax.random.split(key)
    x = jax.random.normal(kx, (BATCH, SEQ_LEN, C_IN, WIDTH), dtype=jnp.float32)
    # Deterministic stand-in for torch.randn(num_kernels, *kernel_size)
    kernels = jax.random.normal(kker, (NUM_KERNELS,) + KERNEL_SIZE,
                                dtype=jnp.float32)

    out = jax.jit(token_embedding_forward, static_argnums=2)(x, kernels, 0)
    out = jax.block_until_ready(out)

    ref = token_embedding_reference(x, kernels, 0)
    np.testing.assert_allclose(np.asarray(out), np.asarray(ref),
                               rtol=1e-5, atol=1e-5)
    expected_feat = ((KERNEL_SIZE[1] * SEQ_LEN + 1) * WIDTH *
                     (C_IN * (NUM_KERNELS - 1) + 1)) // SEQ_LEN
    assert out.shape == (BATCH, SEQ_LEN, expected_feat)
    print("KERNEL_OK")
</pallas_src>

<mosaic_0001>
module attributes {stable_mosaic.version = 11 : i64} {
  func.func @_conv_tap_kernel(%arg0: memref<6x24xf32, #tpu.memory_space<vmem>>, %arg1: memref<24x300xf32, #tpu.memory_space<vmem>>, %arg2: memref<6x300xf32, #tpu.memory_space<vmem>>) attributes {dimension_semantics = [], scalar_prefetch = 0 : i64, scratch_operands = 0 : i64, tpu.core_type = #tpu.core_type<tc>} {
    %c0 = arith.constant 0 : index
    %c0_0 = arith.constant 0 : index
    %0 = vector.load %arg0[%c0, %c0_0] : memref<6x24xf32, #tpu.memory_space<vmem>>, vector<6x24xf32>
    %c0_1 = arith.constant 0 : index
    %c0_2 = arith.constant 0 : index
    %1 = vector.load %arg1[%c0_1, %c0_2] : memref<24x300xf32, #tpu.memory_space<vmem>>, vector<24x300xf32>
    %2 = vector.extract_strided_slice %0 {offsets = [0, 0], sizes = [6, 1], strides = [1, 1]} : vector<6x24xf32> to vector<6x1xf32>
    %3 = vector.extract_strided_slice %1 {offsets = [0, 0], sizes = [1, 300], strides = [1, 1]} : vector<24x300xf32> to vector<1x300xf32>
    %4 = vector.broadcast %2 : vector<6x1xf32> to vector<6x300xf32>
    %5 = vector.broadcast %3 : vector<1x300xf32> to vector<6x300xf32>
    %6 = arith.mulf %4, %5 : vector<6x300xf32>
    %7 = vector.extract_strided_slice %0 {offsets = [0, 1], sizes = [6, 1], strides = [1, 1]} : vector<6x24xf32> to vector<6x1xf32>
    %8 = vector.extract_strided_slice %1 {offsets = [1, 0], sizes = [1, 300], strides = [1, 1]} : vector<24x300xf32> to vector<1x300xf32>
    %9 = vector.broadcast %7 : vector<6x1xf32> to vector<6x300xf32>
    %10 = vector.broadcast %8 : vector<1x300xf32> to vector<6x300xf32>
    %11 = arith.mulf %9, %10 : vector<6x300xf32>
    %12 = arith.addf %6, %11 : vector<6x300xf32>
    %13 = vector.extract_strided_slice %0 {offsets = [0, 2], sizes = [6, 1], strides = [1, 1]} : vector<6x24xf32> to vector<6x1xf32>
    %14 = vector.extract_strided_slice %1 {offsets = [2, 0], sizes = [1, 300], strides = [1, 1]} : vector<24x300xf32> to vector<1x300xf32>
    %15 = vector.broadcast %13 : vector<6x1xf32> to vector<6x300xf32>
    %16 = vector.broadcast %14 : vector<1x300xf32> to vector<6x300xf32>
    %17 = arith.mulf %15, %16 : vector<6x300xf32>
    %18 = arith.addf %12, %17 : vector<6x300xf32>
    %19 = vector.extract_strided_slice %0 {offsets = [0, 3], sizes = [6, 1], strides = [1, 1]} : vector<6x24xf32> to vector<6x1xf32>
    %20 = vector.extract_strided_slice %1 {offsets = [3, 0], sizes = [1, 300], strides = [1, 1]} : vector<24x300xf32> to vector<1x300xf32>
    %21 = vector.broadcast %19 : vector<6x1xf32> to vector<6x300xf32>
    %22 = vector.broadcast %20 : vector<1x300xf32> to vector<6x300xf32>
    %23 = arith.mulf %21, %22 : vector<6x300xf32>
    %24 = arith.addf %18, %23 : vector<6x300xf32>
    %25 = vector.extract_strided_slice %0 {offsets = [0, 4], sizes = [6, 1], strides = [1, 1]} : vector<6x24xf32> to vector<6x1xf32>
    %26 = vector.extract_strided_slice %1 {offsets = [4, 0], sizes = [1, 300], strides = [1, 1]} : vector<24x300xf32> to vector<1x300xf32>
    %27 = vector.broadcast %25 : vector<6x1xf32> to vector<6x300xf32>
    %28 = vector.broadcast %26 : vector<1x300xf32> to vector<6x300xf32>
    %29 = arith.mulf %27, %28 : vector<6x300xf32>
    %30 = vector.extract_strided_slice %0 {offsets = [0, 5], sizes = [6, 1], strides = [1, 1]} : vector<6x24xf32> to vector<6x1xf32>
    %31 = vector.extract_strided_slice %1 {offsets = [5, 0], sizes = [1, 300], strides = [1, 1]} : vector<24x300xf32> to vector<1x300xf32>
    %32 = vector.broadcast %30 : vector<6x1xf32> to vector<6x300xf32>
    %33 = vector.broadcast %31 : vector<1x300xf32> to vector<6x300xf32>
    %34 = arith.mulf %32, %33 : vector<6x300xf32>
    %35 = arith.addf %29, %34 : vector<6x300xf32>
    %36 = vector.extract_strided_slice %0 {offsets = [0, 6], sizes = [6, 1], strides = [1, 1]} : vector<6x24xf32> to vector<6x1xf32>
    %37 = vector.extract_strided_slice %1 {offsets = [6, 0], sizes = [1, 300], strides = [1, 1]} : vector<24x300xf32> to vector<1x300xf32>
    %38 = vector.broadcast %36 : vector<6x1xf32> to vector<6x300xf32>
    %39 = vector.broadcast %37 : vector<1x300xf32> to vector<6x300xf32>
    %40 = arith.mulf %38, %39 : vector<6x300xf32>
    %41 = arith.addf %35, %40 : vector<6x300xf32>
    %42 = vector.extract_strided_slice %0 {offsets = [0, 7], sizes = [6, 1], strides = [1, 1]} : vector<6x24xf32> to vector<6x1xf32>
    %43 = vector.extract_strided_slice %1 {offsets = [7, 0], sizes = [1, 300], strides = [1, 1]} : vector<24x300xf32> to vector<1x300xf32>
    %44 = vector.broadcast %42 : vector<6x1xf32> to vector<6x300xf32>
    %45 = vector.broadcast %43 : vector<1x300xf32> to vector<6x300xf32>
    %46 = arith.mulf %44, %45 : vector<6x300xf32>
    %47 = arith.addf %41, %46 : vector<6x300xf32>
    %48 = vector.extract_strided_slice %0 {offsets = [0, 8], sizes = [6, 1], strides = [1, 1]} : vector<6x24xf32> to vector<6x1xf32>
    %49 = vector.extract_strided_slice %1 {offsets = [8, 0], sizes = [1, 300], strides = [1, 1]} : vector<24x300xf32> to vector<1x300xf32>
    %50 = vector.broadcast %48 : vector<6x1xf32> to vector<6x300xf32>
    %51 = vector.broadcast %49 : vector<1x300xf32> to vector<6x300xf32>
    %52 = arith.mulf %50, %51 : vector<6x300xf32>
    %53 = vector.extract_strided_slice %0 {offsets = [0, 9], sizes = [6, 1], strides = [1, 1]} : vector<6x24xf32> to vector<6x1xf32>
    %54 = vector.extract_strided_slice %1 {offsets = [9, 0], sizes = [1, 300], strides = [1, 1]} : vector<24x300xf32> to vector<1x300xf32>
    %55 = vector.broadcast %53 : vector<6x1xf32> to vector<6x300xf32>
    %56 = vector.broadcast %54 : vector<1x300xf32> to vector<6x300xf32>
    %57 = arith.mulf %55, %56 : vector<6x300xf32>
    %58 = arith.addf %52, %57 : vector<6x300xf32>
    %59 = vector.extract_strided_slice %0 {offsets = [0, 10], sizes = [6, 1], strides = [1, 1]} : vector<6x24xf32> to vector<6x1xf32>
    %60 = vector.extract_strided_slice %1 {offsets = [10, 0], sizes = [1, 300], strides = [1, 1]} : vector<24x300xf32> to vector<1x300xf32>
    %61 = vector.broadcast %59 : vector<6x1xf32> to vector<6x300xf32>
    %62 = vector.broadcast %60 : vector<1x300xf32> to vector<6x300xf32>
    %63 = arith.mulf %61, %62 : vector<6x300xf32>
    %64 = arith.addf %58, %63 : vector<6x300xf32>
    %65 = vector.extract_strided_slice %0 {offsets = [0, 11], sizes = [6, 1], strides = [1, 1]} : vector<6x24xf32> to vector<6x1xf32>
    %66 = vector.extract_strided_slice %1 {offsets = [11, 0], sizes = [1, 300], strides = [1, 1]} : vector<24x300xf32> to vector<1x300xf32>
    %67 = vector.broadcast %65 : vector<6x1xf32> to vector<6x300xf32>
    %68 = vector.broadcast %66 : vector<1x300xf32> to vector<6x300xf32>
    %69 = arith.mulf %67, %68 : vector<6x300xf32>
    %70 = arith.addf %64, %69 : vector<6x300xf32>
    %71 = vector.extract_strided_slice %0 {offsets = [0, 12], sizes = [6, 1], strides = [1, 1]} : vector<6x24xf32> to vector<6x1xf32>
    %72 = vector.extract_strided_slice %1 {offsets = [12, 0], sizes = [1, 300], strides = [1, 1]} : vector<24x300xf32> to vector<1x300xf32>
    %73 = vector.broadcast %71 : vector<6x1xf32> to vector<6x300xf32>
    %74 = vector.broadcast %72 : vector<1x300xf32> to vector<6x300xf32>
    %75 = arith.mulf %73, %74 : vector<6x300xf32>
    %76 = vector.extract_strided_slice %0 {offsets = [0, 13], sizes = [6, 1], strides = [1, 1]} : vector<6x24xf32> to vector<6x1xf32>
    %77 = vector.extract_strided_slice %1 {offsets = [13, 0], sizes = [1, 300], strides = [1, 1]} : vector<24x300xf32> to vector<1x300xf32>
    %78 = vector.broadcast %76 : vector<6x1xf32> to vector<6x300xf32>
    %79 = vector.broadcast %77 : vector<1x300xf32> to vector<6x300xf32>
    %80 = arith.mulf %78, %79 : vector<6x300xf32>
    %81 = arith.addf %75, %80 : vector<6x300xf32>
    %82 = vector.extract_strided_slice %0 {offsets = [0, 14], sizes = [6, 1], strides = [1, 1]} : vector<6x24xf32> to vector<6x1xf32>
    %83 = vector.extract_strided_slice %1 {offsets = [14, 0], sizes = [1, 300], strides = [1, 1]} : vector<24x300xf32> to vector<1x300xf32>
    %84 = vector.broadcast %82 : vector<6x1xf32> to vector<6x300xf32>
    %85 = vector.broadcast %83 : vector<1x300xf32> to vector<6x300xf32>
    %86 = arith.mulf %84, %85 : vector<6x300xf32>
    %87 = arith.addf %81, %86 : vector<6x300xf32>
    %88 = vector.extract_strided_slice %0 {offsets = [0, 15], sizes = [6, 1], strides = [1, 1]} : vector<6x24xf32> to vector<6x1xf32>
    %89 = vector.extract_strided_slice %1 {offsets = [15, 0], sizes = [1, 300], strides = [1, 1]} : vector<24x300xf32> to vector<1x300xf32>
    %90 = vector.broadcast %88 : vector<6x1xf32> to vector<6x300xf32>
    %91 = vector.broadcast %89 : vector<1x300xf32> to vector<6x300xf32>
    %92 = arith.mulf %90, %91 : vector<6x300xf32>
    %93 = arith.addf %87, %92 : vector<6x300xf32>
    %94 = vector.extract_strided_slice %0 {offsets = [0, 16], sizes = [6, 1], strides = [1, 1]} : vector<6x24xf32> to vector<6x1xf32>
    %95 = vector.extract_strided_slice %1 {offsets = [16, 0], sizes = [1, 300], strides = [1, 1]} : vector<24x300xf32> to vector<1x300xf32>
    %96 = vector.broadcast %94 : vector<6x1xf32> to vector<6x300xf32>
    %97 = vector.broadcast %95 : vector<1x300xf32> to vector<6x300xf32>
    %98 = arith.mulf %96, %97 : vector<6x300xf32>
    %99 = vector.extract_strided_slice %0 {offsets = [0, 17], sizes = [6, 1], strides = [1, 1]} : vector<6x24xf32> to vector<6x1xf32>
    %100 = vector.extract_strided_slice %1 {offsets = [17, 0], sizes = [1, 300], strides = [1, 1]} : vector<24x300xf32> to vector<1x300xf32>
    %101 = vector.broadcast %99 : vector<6x1xf32> to vector<6x300xf32>
    %102 = vector.broadcast %100 : vector<1x300xf32> to vector<6x300xf32>
    %103 = arith.mulf %101, %102 : vector<6x300xf32>
    %104 = arith.addf %98, %103 : vector<6x300xf32>
    %105 = vector.extract_strided_slice %0 {offsets = [0, 18], sizes = [6, 1], strides = [1, 1]} : vector<6x24xf32> to vector<6x1xf32>
    %106 = vector.extract_strided_slice %1 {offsets = [18, 0], sizes = [1, 300], strides = [1, 1]} : vector<24x300xf32> to vector<1x300xf32>
    %107 = vector.broadcast %105 : vector<6x1xf32> to vector<6x300xf32>
    %108 = vector.broadcast %106 : vector<1x300xf32> to vector<6x300xf32>
    %109 = arith.mulf %107, %108 : vector<6x300xf32>
    %110 = arith.addf %104, %109 : vector<6x300xf32>
    %111 = vector.extract_strided_slice %0 {offsets = [0, 19], sizes = [6, 1], strides = [1, 1]} : vector<6x24xf32> to vector<6x1xf32>
    %112 = vector.extract_strided_slice %1 {offsets = [19, 0], sizes = [1, 300], strides = [1, 1]} : vector<24x300xf32> to vector<1x300xf32>
    %113 = vector.broadcast %111 : vector<6x1xf32> to vector<6x300xf32>
    %114 = vector.broadcast %112 : vector<1x300xf32> to vector<6x300xf32>
    %115 = arith.mulf %113, %114 : vector<6x300xf32>
    %116 = arith.addf %110, %115 : vector<6x300xf32>
    %117 = vector.extract_strided_slice %0 {offsets = [0, 20], sizes = [6, 1], strides = [1, 1]} : vector<6x24xf32> to vector<6x1xf32>
    %118 = vector.extract_strided_slice %1 {offsets = [20, 0], sizes = [1, 300], strides = [1, 1]} : vector<24x300xf32> to vector<1x300xf32>
    %119 = vector.broadcast %117 : vector<6x1xf32> to vector<6x300xf32>
    %120 = vector.broadcast %118 : vector<1x300xf32> to vector<6x300xf32>
    %121 = arith.mulf %119, %120 : vector<6x300xf32>
    %122 = vector.extract_strided_slice %0 {offsets = [0, 21], sizes = [6, 1], strides = [1, 1]} : vector<6x24xf32> to vector<6x1xf32>
    %123 = vector.extract_strided_slice %1 {offsets = [21, 0], sizes = [1, 300], strides = [1, 1]} : vector<24x300xf32> to vector<1x300xf32>
    %124 = vector.broadcast %122 : vector<6x1xf32> to vector<6x300xf32>
    %125 = vector.broadcast %123 : vector<1x300xf32> to vector<6x300xf32>
    %126 = arith.mulf %124, %125 : vector<6x300xf32>
    %127 = arith.addf %121, %126 : vector<6x300xf32>
    %128 = vector.extract_strided_slice %0 {offsets = [0, 22], sizes = [6, 1], strides = [1, 1]} : vector<6x24xf32> to vector<6x1xf32>
    %129 = vector.extract_strided_slice %1 {offsets = [22, 0], sizes = [1, 300], strides = [1, 1]} : vector<24x300xf32> to vector<1x300xf32>
    %130 = vector.broadcast %128 : vector<6x1xf32> to vector<6x300xf32>
    %131 = vector.broadcast %129 : vector<1x300xf32> to vector<6x300xf32>
    %132 = arith.mulf %130, %131 : vector<6x300xf32>
    %133 = arith.addf %127, %132 : vector<6x300xf32>
    %134 = vector.extract_strided_slice %0 {offsets = [0, 23], sizes = [6, 1], strides = [1, 1]} : vector<6x24xf32> to vector<6x1xf32>
    %135 = vector.extract_strided_slice %1 {offsets = [23, 0], sizes = [1, 300], strides = [1, 1]} : vector<24x300xf32> to vector<1x300xf32>
    %136 = vector.broadcast %134 : vector<6x1xf32> to vector<6x300xf32>
    %137 = vector.broadcast %135 : vector<1x300xf32> to vector<6x300xf32>
    %138 = arith.mulf %136, %137 : vector<6x300xf32>
    %139 = arith.addf %133, %138 : vector<6x300xf32>
    %140 = arith.addf %24, %47 : vector<6x300xf32>
    %141 = arith.addf %70, %93 : vector<6x300xf32>
    %142 = arith.addf %116, %139 : vector<6x300xf32>
    %143 = arith.addf %140, %141 : vector<6x300xf32>
    %144 = arith.addf %143, %142 : vector<6x300xf32>
    %c0_3 = arith.constant 0 : index
    %c0_4 = arith.constant 0 : index
    %145 = vector.load %arg2[%c0_3, %c0_4] : memref<6x300xf32, #tpu.memory_space<vmem>>, vector<6x300xf32>
    tpu.vector_store %arg2[%c0_3, %c0_4], %144 {strides = array<i32>} : memref<6x300xf32, #tpu.memory_space<vmem>>, vector<6x300xf32>,
    return
  }
}

</mosaic_0001>

<bundles_post_ra>
// kernel: token_embedding_forward.1
= control target key start
LH: loop header
LB: loop body
LE: loop exit
PB: predicated region body
PF: predicated region fallthrough
CT: control target
= control target key end

     0   :  { %v387_v0 = vmov 2   ;;  %v388_v1 = vmov 0   ;;  %v389_v3 = vmov 4   ;;  %v390_v4 = vmov 3   ;;  %s730_s0 = inlined_call_operand.vmem [shape: f32[6,24], index: 0, kind: input, shape index: {}]   ;;  %s731_s1 = inlined_call_operand.vmem [shape: f32[24,300], index: 1, kind: input, shape index: {}]   ;;  %s732_s2 = inlined_call_operand.vmem [shape: f32[6,300], index: 2, kind: output, shape index: {}]  }
   0x1   :  { %365 = vset.pattern.permute.xlu1 %v387_v0  ;;  %363 = vset.pattern.permute.xlu0 %v388_v1  ;;  %v429_v2 = vld [vmem:[%s730_s0] sm:$0x3f]  ;;  %v391_v5 = vmov 1   ;;  %v392_v6 = vmov 5   ;;  %v393_v7 = vmov 6   ;;  %v394_v8 = vmov 8  }
   0x2   :  { %46 = vperm.xlu1 %365, %v429_v2   ;;  %23 = vperm.xlu0 %363, %v429_v2   ;;  %v395_v9 = vmov 7   ;;  %v396_v10 = vmov 9   ;;  %v397_v11 = vmov 13   ;;  %v398_v12 = vmov 10   ;;  %v470_v33 = vld [vmem:[%s731_s1] sm:$0xff]  ;;  %v475_v34 = vld [vmem:[%s731_s1 + $0x8] sm:$0xff] }
   0x3   :  { %367 = vset.pattern.permute.xlu2 %v389_v3  ;;  %v399_v13 = vmov 11   ;;  %v400_v14 = vmov 20   ;;  %v401_v15 = vmov 12   ;;  %v402_v16 = vmov 14   ;;  %v480_v35 = vld [vmem:[%s731_s1 + $0x10] sm:$0xff]  ;;  %v507_v62 = vld [vmem:[%s731_s1 + $0x18] sm:$0xff] }
   0x4   :  { %72 = vperm.xlu2 %367, %v429_v2   ;;  %v403_v17 = vmov 23   ;;  %v404_v18 = vmov 15   ;;  %v405_v19 = vmov 16   ;;  %v406_v20 = vmov 17   ;;  %v520_v3 = vld [vmem:[%s731_s1 + $0x28] sm:$0xff] }
   0x5   :  { %v407_v21 = vmov 21   ;;  %v408_v22 = vmov 18   ;;  %v409_v23 = vmov 22   ;;  %v410_v24 = vmov 19  }
   0x6   :  { %v75_v36 = vperm.slane %v470_v33, 4  ;;  %v76_v37 = vperm.slane %v475_v34, 4  ;;  %v77_v38 = vperm.slane %v480_v35, 4  ;;  %v85_v39 = vperm.slane %v470_v33, 5 }
   0x7   :  { %v86_v40 = vperm.slane %v475_v34, 5  ;;  %v87_v41 = vperm.slane %v480_v35, 5  ;;  %v49_v43 = vperm.slane %v470_v33, 2  ;;  %v50_v44 = vperm.slane %v475_v34, 2 }
   0x8   :  { %v51_v46 = vperm.slane %v480_v35, 2  ;;  %v26_v47 = vperm.slane %v470_v33, 0  ;;  %v27_v48 = vperm.slane %v475_v34, 0  ;;  %v28_v49 = vperm.slane %v480_v35, 0 }
   0x9   :  { %v62_v52 = vperm.slane %v470_v33, 3  ;;  %v63_v53 = vperm.slane %v475_v34, 3  ;;  %v64_v58 = vperm.slane %v480_v35, 3  ;;  %v36_v59 = vperm.slane %v470_v33, 1 }
   0xa   :  { %366 = vset.pattern.permute.xlu1 %v390_v4  ;;  %364 = vset.pattern.permute.xlu0 %v391_v5  ;;  %v37_v60 = vperm.slane %v475_v34, 1  ;;  %v38_v61 = vperm.slane %v480_v35, 1  ;;  %v111_v63 = vperm.slane %v470_v33, 7  ;;  %v112_v0 = vperm.slane %v475_v34, 7 }
   0xb   :  { %59 = vperm.xlu1 %366, %v429_v2   ;;  %33 = vperm.xlu0 %364, %v429_v2   ;;  %v113_v1 = vperm.slane %v480_v35, 7  ;;  %v147_v4 = vperm.slane %v507_v62, 2  ;;  %vm333_vm0 = vcmask 357376  }
   0xc   :  { %368 = vset.pattern.permute.xlu2 %v392_v6 }
   0xd   :  { %82 = vperm.xlu2 %368, %v429_v2  }
  0x13   :  { %369 = vset.pattern.permute.xlu1 %v393_v7  ;;  %371 = vset.pattern.permute.xlu0 %v394_v8  ;;  %v149_v7 = vperm.slane %v520_v3, 2  ;;  %v98_v8 = vperm.slane %v470_v33, 6 }
  0x14   :  { %95 = vperm.xlu1 %369, %v429_v2   ;;  %121 = vperm.xlu0 %371, %v429_v2  }
  0x15   :  { %370 = vset.pattern.permute.xlu2 %v395_v9  ;;  %v99_v9 = vperm.slane %v475_v34, 6 }
  0x16   :  { %108 = vperm.xlu2 %370, %v429_v2  }
  0x1c   :  { %372 = vset.pattern.permute.xlu1 %v396_v10  ;;  %376 = vset.pattern.permute.xlu0 %v397_v11 }
  0x1d   :  { %131 = vperm.xlu1 %372, %v429_v2   ;;  %180 = vperm.xlu0 %376, %v429_v2  }
  0x1e   :  { %373 = vset.pattern.permute.xlu2 %v398_v12 }
  0x1f   :  { %144 = vperm.xlu2 %373, %v429_v2  }
  0x25   :  { %374 = vset.pattern.permute.xlu1 %v399_v13  ;;  %381 = vset.pattern.permute.xlu0 %v400_v14  ;;  %v100_v13 = vperm.slane %v480_v35, 6  ;;  %v173_v14 = vperm.slane %v507_v62, 4 }
  0x26   :  { %157 = vperm.xlu1 %374, %v429_v2   ;;  %268 = vperm.xlu0 %381, %v429_v2  }
  0x27   :  { %375 = vset.pattern.permute.xlu2 %v401_v15 }
  0x28   :  { %170 = vperm.xlu2 %375, %v429_v2  }
  0x2e   :  { %377 = vset.pattern.permute.xlu1 %v402_v16  ;;  %386 = vset.pattern.permute.xlu0 %v403_v17  ;;  %v175_v16 = vperm.slane %v520_v3, 4  ;;  %v134_v17 = vperm.slane %v507_v62, 1 }
  0x2f   :  { %193 = vperm.xlu1 %377, %v429_v2   ;;  %304 = vperm.xlu0 %386, %v429_v2  }
  0x30   :  { %378 = vset.pattern.permute.xlu2 %v404_v18 }
  0x31   :  { %206 = vperm.xlu2 %378, %v429_v2  }
  0x37   :  { %379 = vset.pattern.permute.xlu1 %v405_v19 }
  0x38   :  { %219 = vperm.xlu1 %379, %v429_v2  }
  0x39   :  { %380 = vset.pattern.permute.xlu2 %v406_v20 }
  0x3a   :  { %229 = vperm.xlu2 %380, %v429_v2  }
  0x40   :  { %382 = vset.pattern.permute.xlu1 %v407_v21 }
  0x41   :  { %278 = vperm.xlu1 %382, %v429_v2  }
  0x42   :  { %383 = vset.pattern.permute.xlu2 %v408_v22  ;;  %v136_v22 = vperm.slane %v520_v3, 1 }
  0x43   :  { %242 = vperm.xlu2 %383, %v429_v2  }
  0x49   :  { %384 = vset.pattern.permute.xlu1 %v409_v23 }
  0x4a   :  { %291 = vperm.xlu1 %384, %v429_v2  }
  0x4b   :  { %385 = vset.pattern.permute.xlu2 %v410_v24  ;;  %v124_v24 = vperm.slane %v507_v62, 0 }
  0x4c   :  { %255 = vperm.xlu2 %385, %v429_v2   ;;  %v515_v2 = vld [vmem:[%s731_s1 + $0x20] sm:$0xff] }
  0x4d   :  { %v148_v6 = vperm.slane %v515_v2, 2  ;;  %v174_v15 = vperm.slane %v515_v2, 4  ;;  %v135_v21 = vperm.slane %v515_v2, 1 }
  0x5e   :  { %v73_v25 = vpop.permute.xlu2 %72 }
  0x5f   :  { %v78_v50 = vmul.f32 %v75_v36, %v73_v25  ;;  %v79_v51 = vmul.f32 %v76_v37, %v73_v25  ;;  %v80_v54 = vmul.f32 %v77_v38, %v73_v25  ;;  %v125_v25 = vperm.slane %v515_v2, 0 }
  0x67   :  { %v83_v26 = vpop.permute.xlu2 %82 }
  0x68   :  { %v88_v55 = vmul.f32 %v85_v39, %v83_v26  ;;  %v89_v56 = vmul.f32 %v86_v40, %v83_v26  ;;  %v90_v57 = vmul.f32 %v87_v41, %v83_v26  ;;  %v126_v26 = vperm.slane %v520_v3, 0 }
  0x69   :  { %v209_v39 = vperm.slane %v507_v62, 7  ;;  %v210_v40 = vperm.slane %v515_v2, 7 }
  0x6a   :  { %v527_v10 = vadd.f32 %v88_v55, %v78_v50  ;;  %v529_v11 = vadd.f32 %v89_v56, %v79_v51  ;;  %v531_v12 = vadd.f32 %v90_v57, %v80_v54  ;;  %v211_v55 = vperm.slane %v520_v3, 7 }
  0x6b   :  { %v160_v56 = vperm.slane %v507_v62, 3 }
  0x70   :  { %v457_v28 = vpop.permute.xlu2 %108 }
  0x71   :  { %v544_v23 = vmul.f32 %v111_v63, %v457_v28  ;;  %v552_v37 = vmul.f32 %v112_v0, %v457_v28  ;;  %v555_v38 = vmul.f32 %v113_v1, %v457_v28 }
  0x74   :  { %v455_v27 = vpop.permute.xlu1 %46  ;;  %v465_v32 = vpop.permute.xlu0 %23 }
  0x75   :  { %v29_v19 = vmul.f32 %v26_v47, %v465_v32  ;;  %v30_v41 = vmul.f32 %v27_v48, %v465_v32  ;;  %v31_v47 = vmul.f32 %v28_v49, %v465_v32  ;;  %v52_v28 = vmul.f32 %v49_v43, %v455_v27  ;;  %v571_v32 = vld [vmem:[%s731_s1 + $0x30] sm:$0xff] }
  0x76   :  { %v54_v63 = vmul.f32 %v51_v46, %v455_v27  ;;  %v591_v46 = vld [vmem:[%s731_s1 + $0x40] sm:$0xff] }
  0x79   :  { %v461_v30 = vpop.permute.xlu2 %144 }
  0x7a   :  { %v574_v49 = vmul.f32 %v147_v4, %v461_v30  ;;  %v580_v43 = vmul.f32 %v149_v7, %v461_v30  ;;  %v184_v4 = vperm.slane %v515_v2, 5  ;;  %v232_v7 = vperm.slane %v571_v32, 1 }
  0x7d   :  { %v459_v29 = vpop.permute.xlu1 %59  ;;  %v34_v5 = vpop.permute.xlu0 %33 }
  0x7e   :  { %v39_v20 = vmul.f32 %v36_v59, %v34_v5  ;;  %v40_v50 = vmul.f32 %v37_v60, %v34_v5  ;;  %v41_v51 = vmul.f32 %v38_v61, %v34_v5  ;;  %v53_v59 = vmul.f32 %v50_v44, %v455_v27  ;;  %v586_v27 = vld [vmem:[%s731_s1 + $0x38] sm:$0xff] }
  0x7f   :  { %v577_v60 = vmul.f32 %v148_v6, %v461_v30  ;;  %v183_v44 = vperm.slane %v507_v62, 5  ;;  %v185_v5 = vperm.slane %v520_v3, 5  ;;  %v233_v57 = vperm.slane %v586_v27, 1 }
  0x80   :  { %v42_v54 = vadd.f32 %v39_v20, %v29_v19  ;;  %v43_v61 = vadd.f32 %v40_v50, %v30_v41  ;;  %v44_v1 = vadd.f32 %v41_v51, %v31_v47  ;;  %v234_v41 = vperm.slane %v591_v46, 1 }
  0x81   :  { %v65_v50 = vmul.f32 %v62_v52, %v459_v29 }
  0x82   :  { %v492_v45 = vpop.permute.xlu2 %170  ;;  %v55_v30 = vadd.f32 %v52_v28, %v42_v54  ;;  %v56_v28 = vadd.f32 %v53_v59, %v43_v61  ;;  %v617_v19 = vadd.f32 %v54_v63, %v44_v1 }
  0x83   :  { %v176_v47 = vmul.f32 %v173_v14, %v492_v45 }
  0x84   :  { %v620_v52 = vadd.f32 %v65_v50, %v55_v30  ;;  %v282_v50 = vperm.slane %v586_v27, 5 }
  0x86   :  { %v463_v31 = vpop.permute.xlu1 %95  ;;  %v122_v0 = vpop.permute.xlu0 %121 }
  0x87   :  { %v101_v6 = vmul.f32 %v98_v8, %v463_v31  ;;  %v102_v48 = vmul.f32 %v99_v9, %v463_v31  ;;  %v66_v8 = vmul.f32 %v63_v53, %v459_v29  ;;  %v103_v51 = vmul.f32 %v100_v13, %v463_v31 }
  0x88   :  { %v615_v9 = vmul.f32 %v64_v58, %v459_v29  ;;  %v177_v53 = vmul.f32 %v174_v15, %v492_v45  ;;  %v178_v31 = vmul.f32 %v175_v16, %v492_v45  ;;  %v127_v54 = vmul.f32 %v124_v24, %v122_v0 }
  0x89   :  { %v104_v34 = vadd.f32 %v101_v6, %v527_v10  ;;  %v105_v13 = vadd.f32 %v102_v48, %v529_v11  ;;  %v128_v35 = vmul.f32 %v125_v25, %v122_v0  ;;  %v129_v29 = vmul.f32 %v126_v26, %v122_v0 }
  0x8a   :  { %v106_v59 = vadd.f32 %v103_v51, %v531_v12  ;;  %v636_v15 = vadd.f32 %v66_v8, %v56_v28  ;;  %v245_v11 = vperm.slane %v571_v32, 2  ;;  %v246_v16 = vperm.slane %v586_v27, 2 }
  0x8b   :  { %v549_v36 = vpop.permute.xlu2 %206  ;;  %v247_v12 = vperm.slane %v591_v46, 2  ;;  %v642_v24 = vadd.f32 %v544_v23, %v104_v34  ;;  %v223_v25 = vperm.slane %v586_v27, 0  ;;  %v648_v26 = vadd.f32 %v552_v37, %v105_v13 }
  0x8c   :  { %v651_v48 = vadd.f32 %v555_v38, %v106_v59  ;;  %v212_v30 = vmul.f32 %v209_v39, %v549_v36  ;;  %v213_v6 = vmul.f32 %v210_v40, %v549_v36  ;;  %v214_v37 = vmul.f32 %v211_v55, %v549_v36 }
  0x8d   :  { %v283_v40 = vperm.slane %v591_v46, 5  ;;  %v271_v13 = vperm.slane %v571_v32, 4  ;;  %v735_v59 = vperm.slane %v515_v2, 6 }
  0x8f   :  { %v488_v42 = vpop.permute.xlu1 %131  ;;  %v181_v58 = vpop.permute.xlu0 %180 }
  0x90   :  { %v137_v14 = vmul.f32 %v134_v17, %v488_v42  ;;  %v138_v10 = vmul.f32 %v135_v21, %v488_v42  ;;  %v139_v45 = vmul.f32 %v136_v22, %v488_v42  ;;  %v222_v17 = vperm.slane %v571_v32, 0 }
  0x91   :  { %v224_v21 = vperm.slane %v591_v46, 0  ;;  %v186_v42 = vmul.f32 %v183_v44, %v181_v58  ;;  %v187_v22 = vmul.f32 %v184_v4, %v181_v58  ;;  %v188_v63 = vmul.f32 %v185_v5, %v181_v58 }
  0x92   :  { %v140_v61 = vadd.f32 %v137_v14, %v127_v54  ;;  %v141_v1 = vadd.f32 %v138_v10, %v128_v35  ;;  %v142_v23 = vadd.f32 %v139_v45, %v129_v29  ;;  %v258_v44 = vperm.slane %v571_v32, 3 }
  0x93   :  { %v281_v5 = vperm.slane %v571_v32, 5  ;;  %v189_v8 = vadd.f32 %v186_v42, %v176_v47  ;;  %v190_v39 = vadd.f32 %v187_v22, %v177_v53  ;;  %v191_v51 = vadd.f32 %v188_v63, %v178_v31 }
  0x94   :  { %v230_v33 = vpop.permute.xlu2 %229  ;;  %v153_v34 = vadd.f32 %v574_v49, %v140_v61  ;;  %v154_v36 = vadd.f32 %v577_v60, %v141_v1  ;;  %v155_v55 = vadd.f32 %v580_v43, %v142_v23  ;;  %v272_v47 = vperm.slane %v586_v27, 4 }
  0x95   :  { %v235_v35 = vmul.f32 %v232_v7, %v230_v33  ;;  %v236_v29 = vmul.f32 %v233_v57, %v230_v33  ;;  %v273_v53 = vperm.slane %v591_v46, 4  ;;  %v733_v49 = vperm.slane %v515_v2, 3 }
  0x96   :  { %v237_v43 = vmul.f32 %v234_v41, %v230_v33  ;;  %v294_v58 = vperm.slane %v571_v32, 6  ;;  %v734_v57 = vperm.slane %v507_v62, 6  ;;  %v295_v45 = vperm.slane %v586_v27, 6 }
  0x97   :  { %v737_v42 = vperm.slane %v520_v3, 3  ;;  %v296_v62 = vperm.slane %v591_v46, 6 }
  0x98   :  { %v538_v18 = vpop.permute.xlu1 %157  ;;  %v269_v28 = vpop.permute.xlu0 %268 }
  0x99   :  { %v163_v31 = vmul.f32 %v160_v56, %v538_v18  ;;  %v164_v60 = vmul.f32 %v733_v49, %v538_v18  ;;  %v736_v56 = vperm.slane %v520_v3, 6  ;;  %v165_v41 = vmul.f32 %v737_v42, %v538_v18 }
  0x9a   :  { %v274_v63 = vmul.f32 %v271_v13, %v269_v28  ;;  %v275_v23 = vmul.f32 %v272_v47, %v269_v28  ;;  %v276_v2 = vmul.f32 %v273_v53, %v269_v28  ;;  %v309_v3 = vperm.slane %v591_v46, 7 }
  0x9b   :  { %v166_v49 = vadd.f32 %v163_v31, %v153_v34 }
  0x9d   :  { %v243_v54 = vpop.permute.xlu2 %242 }
  0xa1   :  { %v598_v20 = vpop.permute.xlu1 %193  ;;  %v305_v18 = vpop.permute.xlu0 %304 }
  0xa2   :  { %v199_v7 = vmul.f32 %v734_v57, %v598_v20  ;;  %v200_v14 = vmul.f32 %v735_v59, %v598_v20  ;;  %v201_v10 = vmul.f32 %v736_v56, %v598_v20  ;;  %v167_v57 = vadd.f32 %v164_v60, %v154_v36 }
  0xa3   :  { %v307_v59 = vperm.slane %v571_v32, 7  ;;  %v308_v20 = vperm.slane %v586_v27, 7  ;;  %v316_v32 = vadd.f32 %v642_v24, %v620_v52 }
  0xa4   :  { %v202_v56 = vadd.f32 %v199_v7, %v189_v8  ;;  %v203_v4 = vadd.f32 %v200_v14, %v190_v39  ;;  %v204_v38 = vadd.f32 %v201_v10, %v191_v51  ;;  %v168_v39 = vadd.f32 %v165_v41, %v155_v55 }
  0xa5   :  { %v310_v47 = vmul.f32 %v307_v59, %v305_v18  ;;  %v311_v53 = vmul.f32 %v308_v20, %v305_v18 }
  0xa6   :  { %v256_v36 = vpop.permute.xlu2 %255  ;;  %v215_v31 = vadd.f32 %v212_v30, %v202_v56  ;;  %v216_v60 = vadd.f32 %v213_v6, %v203_v4  ;;  %v217_v7 = vadd.f32 %v214_v37, %v204_v38  ;;  %v70_v38 = vadd.f32 %v615_v9, %v617_v19 }
  0xa8   :  { %v321_v4 = vadd.f32 %v217_v7, %v168_v39 }
  0xaa   :  { %v220_v0 = vpop.permute.xlu1 %219 }
  0xab   :  { %v225_v33 = vmul.f32 %v222_v17, %v220_v0  ;;  %v226_v61 = vmul.f32 %v223_v25, %v220_v0  ;;  %v227_v1 = vmul.f32 %v224_v21, %v220_v0  ;;  %v248_v17 = vmul.f32 %v245_v11, %v243_v54 }
  0xac   :  { %v249_v25 = vmul.f32 %v246_v16, %v243_v54  ;;  %v250_v21 = vmul.f32 %v247_v12, %v243_v54  ;;  %v312_v11 = vmul.f32 %v309_v3, %v305_v18  ;;  %v261_v16 = vmul.f32 %v258_v44, %v256_v36 }
  0xad   :  { %v238_v0 = vadd.f32 %v235_v35, %v225_v33  ;;  %v239_v28 = vadd.f32 %v236_v29, %v226_v61  ;;  %v240_v34 = vadd.f32 %v237_v43, %v227_v1  ;;  %v738_v12 = vperm.slane %v586_v27, 3 }
  0xae   :  { %v739_v35 = vperm.slane %v591_v46, 3  ;;  %v319_v27 = vadd.f32 %v215_v31, %v166_v49  ;;  %v320_v44 = vadd.f32 %v216_v60, %v167_v57  ;;  %v317_v33 = vadd.f32 %v648_v26, %v636_v15 }
  0xaf   :  { %v251_v14 = vadd.f32 %v248_v17, %v238_v0  ;;  %v262_v54 = vmul.f32 %v738_v12, %v256_v36 }
  0xb0   :  { %v263_v29 = vmul.f32 %v739_v35, %v256_v36  ;;  %v325_v9 = vadd.f32 %v319_v27, %v316_v32  ;;  %v326_v1 = vadd.f32 %v320_v44, %v317_v33 }
  0xb3   :  { %v279_v22 = vpop.permute.xlu1 %278 }
  0xb4   :  { %v284_v13 = vmul.f32 %v281_v5, %v279_v22  ;;  %v285_v8 = vmul.f32 %v282_v50, %v279_v22  ;;  %v286_v51 = vmul.f32 %v283_v40, %v279_v22  ;;  %v252_v5 = vadd.f32 %v249_v25, %v239_v28 }
  0xb5   :  { %v253_v50 = vadd.f32 %v250_v21, %v240_v34  ;;  %v318_v22 = vadd.f32 %v651_v48, %v70_v38 }
  0xb6   :  { %v287_v55 = vadd.f32 %v284_v13, %v274_v63  ;;  %v288_v40 = vadd.f32 %v285_v8, %v275_v23  ;;  %v289_v10 = vadd.f32 %v286_v51, %v276_v2 }
  0xb7   :  { %v266_v63 = vadd.f32 %v263_v29, %v253_v50  ;;  %v327_v52 = vadd.f32 %v321_v4, %v318_v22 }
  0xbc   :  { %v292_v43 = vpop.permute.xlu1 %291 }
  0xbd   :  { %v297_v30 = vmul.f32 %v294_v58, %v292_v43  ;;  %v298_v6 = vmul.f32 %v295_v45, %v292_v43  ;;  %v299_v37 = vmul.f32 %v296_v62, %v292_v43  ;;  %v264_v58 = vadd.f32 %v261_v16, %v251_v14 }
  0xbe   :  { %v265_v45 = vadd.f32 %v262_v54, %v252_v5 }
  0xbf   :  { %v300_v46 = vadd.f32 %v297_v30, %v287_v55  ;;  %v301_v42 = vadd.f32 %v298_v6, %v288_v40  ;;  %v302_v41 = vadd.f32 %v299_v37, %v289_v10 }
  0xc1   :  { %v313_v62 = vadd.f32 %v310_v47, %v300_v46  ;;  %v314_v61 = vadd.f32 %v311_v53, %v301_v42  ;;  %v315_v19 = vadd.f32 %v312_v11, %v302_v41 }
  0xc3   :  { %v322_v24 = vadd.f32 %v313_v62, %v264_v58  ;;  %v323_v23 = vadd.f32 %v314_v61, %v265_v45  ;;  %v324_v2 = vadd.f32 %v315_v19, %v266_v63 }
  0xc5   :  { %v328_v49 = vadd.f32 %v325_v9, %v322_v24  ;;  %v329_v57 = vadd.f32 %v326_v1, %v323_v23  ;;  %v330_v59 = vadd.f32 %v327_v52, %v324_v2 }
  0xc7   :  { %331 = vst [vmem:[%s732_s2] sm:$0x3f] %v328_v49 }
  0xc8   :  { %332 = vst [vmem:[%s732_s2 + $0x8] sm:$0x3f] %v329_v57 }
  0xc9   :  { %334 = vst.msk [vmem:[%s732_s2 + $0x10] sm:$0x3f] %vm333_vm0, %v330_v59 }

</bundles_post_ra>
